<compile_context>
chip_gen: v6e
topology: v6e:2x2x1
jax: 0.10.0
libtpu: 0.0.40
codegen_flags: <defaults>
</compile_context>

<pallas_src>
import math

import jax
import jax.numpy as jnp
from jax import lax
from jax.experimental import pallas as pl
from jax.experimental.pallas import tpu as pltpu


def _lora_kernel(x_ref, a_ref, bt_ref, o_ref):
    """One (TILE_B, features) tile: out = x + (x @ A_eff^T) @ Bt_eff.

    x_ref  : VMEM (TILE_B, in_f)   -- streamed per grid step
    a_ref  : VMEM (max_r, in_f)    -- rank-masked lora_A, resident
    bt_ref : VMEM (max_r, out_f)   -- rank-masked scaling*lora_B.T, lane-dense, resident
    """
    x = x_ref[...]

    # t = x @ A^T  (contract in_features of both operands; x stays untouched,
    # only the tiny A tile is the transposed operand).
    t = lax.dot_general(
        x, a_ref[...],
        dimension_numbers=(((1,), (1,)), ((), ())),
        preferred_element_type=jnp.float32,
    )                                                       # (TILE_B, max_r) f32

    # y = t @ (scaling * B^T) against the lane-dense resident tile.
    y = jnp.dot(t.astype(bt_ref.dtype), bt_ref[...],
                preferred_element_type=jnp.float32)         # (TILE_B, out_f) f32

    o_ref[...] = (x.astype(jnp.float32) + y).astype(o_ref.dtype)


def _round_up(x, m):
    return ((x + m - 1) // m) * m


def _vmem_budgets():
    """Generation-aware (streaming_budget_bytes, vmem_limit_bytes)."""
    try:
        cap = int(pltpu.get_tpu_info().vmem_capacity_bytes)
    except Exception:
        cap = 64 * 1024 * 1024  # conservative: assume v7x's 64 MiB / TC
    if cap >= 128 * 1024 * 1024:
        # v5e / v6e: 128 MiB physical -> big tiles restore ~85% HBM roofline.
        return 96 * 1024 * 1024, 112 * 1024 * 1024
    # v7x: 64 MiB per TensorCore -> leave headroom for Mosaic scratch/sems.
    return 44 * 1024 * 1024, 56 * 1024 * 1024


def _pick_tile_b(batch, in_f, out_f, itemsize, weight_bytes, budget):
    """Largest batch tile whose double-buffered x/out streams (+ resident
    weights) fit the streaming budget; multiple of 16 (bf16 sublane pack) and
    capped so the grid has >= 2 steps (v7x megacore) for larger batches."""
    def buffered_bytes(tb):
        # x and out streams double-buffered; weights counted in weight_bytes.
        return 2 * tb * (in_f + out_f) * itemsize + weight_bytes

    if batch >= 32:
        # >= 2 grid steps so dimension_semantics=("parallel",) can shard the
        # batch across both v7x TensorCores (both stream HBM concurrently).
        cap = min(1024, _round_up(pl.cdiv(batch, 2), 16))
    else:
        cap = batch  # single full-dim block (block == array dim is legal)

    tb = cap
    while tb > 16 and buffered_bytes(tb) > budget:
        tb = max(16, _round_up(tb // 2, 16))
    return max(1, min(tb, batch))


def lora_forward(x, lora_A, lora_B, rank, scaling=1.0, tile_b=None):
    batch, in_f = x.shape
    out_f, max_r = lora_B.shape
    if lora_A.shape != (max_r, in_f):
        raise ValueError(f"lora_A shape {lora_A.shape} != {(max_r, in_f)}")
    if in_f != out_f:
        raise ValueError(
            "LoRALayer.forward adds the residual x + ..., which requires "
            f"in_features == out_features (got {in_f} vs {out_f}).")

    # Adapter disabled at trace time -> skip the pallas_call entirely.
    if isinstance(rank, int) and rank <= 0:
        return x

    # Fold dynamic-rank mask + scaling into the tiny weights (once per call).
    # Equivalent to using lora_A[:rank] / lora_B[:, :rank]; masking both sides
    # also makes any Inf/NaN in padded columns of lora_B irrelevant.
    row_mask = (jnp.arange(max_r) < rank)[:, None]                   # (max_r, 1)
    a_eff = jnp.where(row_mask, lora_A, 0).astype(x.dtype)           # (max_r, in_f)
    bt_eff = jnp.where(row_mask, scaling * lora_B.T, 0).astype(x.dtype)  # (max_r, out_f)

    itemsize = jnp.dtype(x.dtype).itemsize
    weight_bytes = 2 * (a_eff.size + bt_eff.size) * itemsize   # double-buffered
    budget, vmem_limit = _vmem_budgets()
    if tile_b is None:
        tile_b = _pick_tile_b(batch, in_f, out_f, itemsize, weight_bytes, budget)

    grid = (pl.cdiv(batch, tile_b),)

    return pl.pallas_call(
        _lora_kernel,
        out_shape=jax.ShapeDtypeStruct((batch, out_f), x.dtype),
        grid_spec=pltpu.PrefetchScalarGridSpec(
            num_scalar_prefetch=0,
            grid=grid,
            in_specs=[
                pl.BlockSpec((tile_b, in_f), lambda i: (i, 0)),   # x streams
                pl.BlockSpec((max_r, in_f), lambda i: (0, 0)),    # A_eff resident
                pl.BlockSpec((max_r, out_f), lambda i: (0, 0)),   # Bt_eff resident
            ],
            out_specs=pl.BlockSpec((tile_b, out_f), lambda i: (i, 0)),
        ),
        compiler_params=pltpu.CompilerParams(
            dimension_semantics=("parallel",),       # megacore on v7x
            vmem_limit_bytes=vmem_limit,             # generation-aware, with headroom
        ),
    )(x, a_eff, bt_eff)


def lora_reference(x, lora_A, lora_B, rank, scaling=1.0):
    # Pure-JAX reference mirroring the PyTorch forward exactly.
    return x + scaling * (lora_B[:, :rank] @ lora_A[:rank, :] @ x.T).T


if __name__ == "__main__":
    key = jax.random.PRNGKey(0)
    k_x, k_a, k_b, k_x2, k_x3 = jax.random.split(key, 5)

    features = 128          # in_features == out_features
    max_rank = 8
    rank = 4

    # kaiming_uniform_(a=sqrt(5)) on (max_rank, in_features):
    # gain = sqrt(2/(1+5)); bound = gain*sqrt(3/fan_in) = 1/sqrt(fan_in)
    bound = 1.0 / math.sqrt(features)
    lora_A = jax.random.uniform(k_a, (max_rank, features), dtype=jnp.float32,
                                minval=-bound, maxval=bound)
    # Module inits lora_B to zeros (output == x); use small random values so
    # the matmul path is actually exercised.
    lora_B = 0.1 * jax.random.normal(k_b, (features, max_rank), dtype=jnp.float32)

    # --- Test 1: small batch, single-tile path -------------------------------
    batch = 8
    x = jax.random.normal(k_x, (batch, features), dtype=jnp.float32)
    out = jax.block_until_ready(lora_forward(x, lora_A, lora_B, rank, scaling=1.0))
    ref = lora_reference(x, lora_A, lora_B, rank, scaling=1.0)
    assert out.shape == (batch, features)
    assert jnp.allclose(out, ref, atol=1e-5, rtol=1e-5), "mismatch vs reference"

    # --- Test 2: batch >= 32 -> auto >=2-step grid (megacore path) ----------
    batch2 = 48
    x2 = jax.random.normal(k_x2, (batch2, features), dtype=jnp.float32)
    out2 = jax.block_until_ready(lora_forward(x2, lora_A, lora_B, rank, scaling=0.5))
    ref2 = lora_reference(x2, lora_A, lora_B, rank, scaling=0.5)
    assert jnp.allclose(out2, ref2, atol=1e-5, rtol=1e-5), "megacore-grid mismatch"

    # --- Test 3: forced small tile -> multi-step grid with partial last block
    batch3 = 24
    x3 = jax.random.normal(k_x3, (batch3, features), dtype=jnp.float32)
    out3 = jax.block_until_ready(
        lora_forward(x3, lora_A, lora_B, rank, scaling=1.0, tile_b=16))
    ref3 = lora_reference(x3, lora_A, lora_B, rank, scaling=1.0)
    assert jnp.allclose(out3, ref3, atol=1e-5, rtol=1e-5), "tiled mismatch"

    # --- Test 4: bf16 streaming (f32 accumulate inside the kernel) ----------
    xb = jax.random.normal(k_x, (16, features), dtype=jnp.float32).astype(jnp.bfloat16)
    outb = jax.block_until_ready(lora_forward(xb, lora_A, lora_B, rank, scaling=1.0))
    refb = lora_reference(xb.astype(jnp.float32), lora_A, lora_B, rank, scaling=1.0)
    assert outb.dtype == jnp.bfloat16
    assert jnp.allclose(outb.astype(jnp.float32), refb, atol=5e-2, rtol=5e-2), \
        "bf16 mismatch"

    # --- Test 5: faithful-to-module init (lora_B == 0) -> identity ----------
    out_zero = jax.block_until_ready(
        lora_forward(x, lora_A, jnp.zeros_like(lora_B), rank))
    assert jnp.allclose(out_zero, x, atol=1e-6)

    # --- Test 6: rank == 0 (static) -> wrapper skips the kernel -------------
    out_r0 = lora_forward(x, lora_A, lora_B, 0)
    assert jnp.allclose(out_r0, x, atol=1e-6)

    print("KERNEL_OK")
</pallas_src>

<mosaic_0001>
module attributes {stable_mosaic.version = 11 : i64} {
  func.func @_lora_kernel(%arg0: i32, %arg1: memref<8x128xf32, #tpu.memory_space<vmem>>, %arg2: memref<8x128xf32, #tpu.memory_space<vmem>>, %arg3: memref<8x128xf32, #tpu.memory_space<vmem>>, %arg4: memref<8x128xf32, #tpu.memory_space<vmem>>) attributes {dimension_semantics = [#tpu.dimension_semantics<parallel>], iteration_bounds = array<i64: 1>, scalar_prefetch = 0 : i64, scratch_operands = 0 : i64, tpu.core_type = #tpu.core_type<tc>, window_params = [{transform_indices = @transform_0, window_bounds = array<i64: 8, 128>}, {pipeline_mode = #tpu.pipeline_mode<synchronous>, transform_indices = @transform_1, window_bounds = array<i64: 8, 128>}, {pipeline_mode = #tpu.pipeline_mode<synchronous>, transform_indices = @transform_2, window_bounds = array<i64: 8, 128>}, {transform_indices = @transform_3, window_bounds = array<i64: 8, 128>}]} {
    %c0 = arith.constant 0 : index
    %c0_0 = arith.constant 0 : index
    %0 = vector.load %arg1[%c0, %c0_0] : memref<8x128xf32, #tpu.memory_space<vmem>>, vector<8x128xf32>
    %c0_1 = arith.constant 0 : index
    %c0_2 = arith.constant 0 : index
    %1 = vector.load %arg2[%c0_1, %c0_2] : memref<8x128xf32, #tpu.memory_space<vmem>>, vector<8x128xf32>
    %cst = arith.constant dense<0.000000e+00> : vector<8x8xf32>
    %2 = tpu.matmul %0, %1, %cst {dimension_numbers = #tpu.dot_dimension_numbers<[1], [1], [0], [0], [0, 0, 1, 0], [], []>} : vector<8x128xf32>, vector<8x128xf32>, vector<8x8xf32> -> vector<8x8xf32>
    %c0_3 = arith.constant 0 : index
    %c0_4 = arith.constant 0 : index
    %3 = vector.load %arg3[%c0_3, %c0_4] : memref<8x128xf32, #tpu.memory_space<vmem>>, vector<8x128xf32>
    %cst_5 = arith.constant dense<0.000000e+00> : vector<8x128xf32>
    %4 = tpu.matmul %2, %3, %cst_5 {dimension_numbers = #tpu.dot_dimension_numbers<[1], [0], [0], [1], [0, 0, 1, 1], [], []>} : vector<8x8xf32>, vector<8x128xf32>, vector<8x128xf32> -> vector<8x128xf32>
    %5 = arith.addf %0, %4 : vector<8x128xf32>
    %c0_6 = arith.constant 0 : index
    %c0_7 = arith.constant 0 : index
    %6 = vector.load %arg4[%c0_6, %c0_7] : memref<8x128xf32, #tpu.memory_space<vmem>>, vector<8x128xf32>
    tpu.vector_store %arg4[%c0_6, %c0_7], %5 {strides = array<i32>} : memref<8x128xf32, #tpu.memory_space<vmem>>, vector<8x128xf32>,
    return
  }
  func.func @transform_0(%arg0: i32) -> (i32, i32) {
    %c0_i32 = arith.constant 0 : i32
    %c0_i32_0 = arith.constant 0 : i32
    return %arg0, %c0_i32 : i32, i32
  }
  func.func @transform_1(%arg0: i32) -> (i32, i32) {
    %c0_i32 = arith.constant 0 : i32
    %c0_i32_0 = arith.constant 0 : i32
    %c0_i32_1 = arith.constant 0 : i32
    return %c0_i32, %c0_i32_0 : i32, i32
  }
  func.func @transform_2(%arg0: i32) -> (i32, i32) {
    %c0_i32 = arith.constant 0 : i32
    %c0_i32_0 = arith.constant 0 : i32
    %c0_i32_1 = arith.constant 0 : i32
    return %c0_i32, %c0_i32_0 : i32, i32
  }
  func.func @transform_3(%arg0: i32) -> (i32, i32) {
    %c0_i32 = arith.constant 0 : i32
    %c0_i32_0 = arith.constant 0 : i32
    return %arg0, %c0_i32 : i32, i32
  }
}

</mosaic_0001>

<bundles_post_ra>
// kernel: tpu_custom_call.1
= control target key start
LH: loop header
LB: loop body
LE: loop exit
PB: predicated region body
PF: predicated region fallthrough
CT: control target
= control target key end

     0   :  { %8 = vsyncpa [#allocation3], 0  ;;  %s360_s0 = inlined_call_operand.hbm [shape: f32[8,128], index: 0, kind: input, shape index: {}]   ;;  %s361_s1 = inlined_call_operand.hbm [shape: f32[8,128], index: 1, kind: input, shape index: {}]   ;;  %s362_s2 = inlined_call_operand.hbm [shape: f32[8,128], index: 2, kind: input, shape index: {}]   ;;  %s363_s3 = inlined_call_operand.hbm [shape: f32[8,128], index: 3, kind: output, shape index: {}]  }
   0x1   :  { %9 = vsyncpa [#allocation6], 0 }
   0x2   :  { %10 = vsyncpa [#allocation4], 0  ;;  %s322_s12 = smov [#allocation5]   ;;  %s323_s14 = smov [#allocation2]  }
   0x3   :  { %s27_s13 = sshll.u32 %s322_s12, 4  ;;  %s17_s15 = sshll.u32 %s323_s14, 4  ;;  %s28_s13 = int_to_ptr.vmem [resolvable:$true] %s27_s13  ;;  %s18_s15 = int_to_ptr.vmem [resolvable:$true] %s17_s15 }
   0x4   :  { %s244_s16 = scalar_lea.vmem %s28_s13, 128  ;;  %p249_p1 = scmp.lt.s32.totalorder %s28_s13, %s28_s13 }
   0x5   :  { %p245_p0 = scmp.ne.s32.totalorder %s28_s13, %s244_s16  ;;  %p250_p2 = scmp.lt.s32.totalorder %s244_s16, %s244_s16 }
   0x7   :  { %p251_p3 = por %p250_p2, %p249_p1 }
   0x9   :  { %p252_p4 = pnand %p251_p3, %p245_p0 }
   0xb   :  { %255 = shalt.err (!%p252_p4)
}
   0xc   :  { %30 = dma.hbm_to_vmem [thread:$0]  %s361_s1, 128, %s28_s13, [#allocation6]  }
   0xd   :  { %s264_s19 = scalar_lea.vmem %s18_s15, 128  ;;  %p269_p6 = scmp.lt.s32.totalorder %s18_s15, %s18_s15 }
   0xe   :  { %p265_p5 = scmp.ne.s32.totalorder %s18_s15, %s264_s19  ;;  %p270_p7 = scmp.lt.s32.totalorder %s264_s19, %s264_s19 }
  0x10   :  { %p271_p8 = por %p270_p7, %p269_p6 }
  0x12   :  { %p272_p9 = pnand %p271_p8, %p265_p5 }
  0x14   :  { %275 = shalt.err (!%p272_p9)
}
  0x15   :  { %20 = dma.hbm_to_vmem [thread:$0]  %s360_s0, 128, %s18_s15, [#allocation3]  }
  0x16   :  { %s324_s22 = smov [#allocation7]  }
  0x17   :  { %s37_s23 = sshll.u32 %s324_s22, 4  ;;  %s38_s23 = int_to_ptr.vmem [resolvable:$true] %s37_s23 }
  0x18   :  { %s284_s24 = scalar_lea.vmem %s38_s23, 128  ;;  %p289_p11 = scmp.lt.s32.totalorder %s38_s23, %s38_s23 }
  0x19   :  { %p285_p10 = scmp.ne.s32.totalorder %s38_s23, %s284_s24  ;;  %p290_p12 = scmp.lt.s32.totalorder %s284_s24, %s284_s24 }
  0x1b   :  { %p291_p13 = por %p290_p12, %p289_p11 }
  0x1d   :  { %p292_p0 = pnand %p291_p13, %p285_p10 }
  0x1f   :  { %295 = shalt.err (!%p292_p0)
}
  0x20   :  { %40 = dma.hbm_to_vmem [thread:$0]  %s362_s2, 128, %s38_s23, [#allocation6]  }
  0x21   :  { %316 = dma.done.wait [#allocation3], 128  }
  0x22   :  { %317 = vsyncadd [#allocation3], 4294967168 }
  0x23   :  { %318 = dma.done.wait [#allocation6], 256  }
  0x24   :  { %319 = vsyncadd [#allocation6], 4294967040  ;;  %v325_v0 = vmov 0.0   ;;  %vm326_vm0 = vmmov 0   ;;  %v51_v1 = vld [vmem:[#allocation5] sm:$0xff]  ;;  %v50_v2 = vld [vmem:[#allocation2] sm:$0xff] }
  0x25   :  { %220 = vmatprep.subr.mxu0 %v325_v0  ;;  %222 = vmatprep.mubr.msk.f32.mxu0 %vm326_vm0, %v325_v0  ;;  %v122_v3 = vld [vmem:[#allocation7] sm:$0xff]  ;;  %vm123_vm1 = vcmask 64512   ;;  %s327_s0 = smov [#allocation8]  }
  0x26   :  { %225 = vmatprep.subr.mxu1 %v325_v0  ;;  %227 = vmatprep.mubr.msk.f32.mxu1 %vm326_vm0, %v325_v0  ;;  %s205_s2 = sshll.u32 %s327_s0, 4  ;;  %s206_s2 = int_to_ptr.vmem [resolvable:$true] %s205_s2 }
  0x27   :  { %221 = vmatpush3.xpose.msra.mxu0 %v51_v1  ;;  %226 = vmatpush3.msra.mxu1 %v122_v3  ;;  %s296_s26 = scalar_lea.vmem %s206_s2, 128  ;;  %p301_p2 = scmp.lt.s32.totalorder %s206_s2, %s206_s2 }
  0x28   :  { %p297_p1 = scmp.ne.s32.totalorder %s206_s2, %s296_s26  ;;  %p302_p3 = scmp.lt.s32.totalorder %s296_s26, %s296_s26 }
  0x2a   :  { %223 = vmatmul.mubr.f32.vlgmr.msra.gmra.mxu0 %v50_v2  ;;  %p303_p4 = por %p302_p3, %p301_p2 }
  0x2c   :  { %p304_p5 = pnand %p303_p4, %p297_p1 }
  0xea   :  { %v118_v4 = vpop.f32.mrf.mxu0 }
  0xeb   :  { %228 = vmatmul.mubr.msk.f32.vlgmr.msra.gmra.mxu1 %vm123_vm1, %v118_v4 }
  0xec   :  { %v224_v5 = vpop.f32.mrf.mxu0 }
 0x1ab   :  { %v193_v6 = vpop.f32.mrf.mxu1 }
 0x1ac   :  { %v197_v7 = vadd.f32 %v193_v6, %v50_v2 }
 0x1ad   :  { %v229_v8 = vpop.f32.mrf.mxu1 }
 0x1ae   :  { %198 = vst [vmem:[#allocation8] sm:$0xff] %v197_v7 }
 0x1af   :  { %307 = shalt.err (!%p304_p5)
}
 0x1b0   :  { %208 = dma.vmem_to_hbm [thread:$0]  %s206_s2, 128, %s363_s3, [#allocation4]  }
 0x1b1   :  { %320 = dma.done.wait [#allocation4], 128  }
 0x1b2   :  { %321 = vsyncadd [#allocation4], 4294967168 }
 0x1b3   :  { %212 = vsyncpa [#allocation3], 1 }
 0x1b4   :  { %213 = vsyncpa [#allocation6], 1 }
 0x1b5   :  { %214 = vsyncpa [#allocation4], 1 }

</bundles_post_ra>
